<compile_context>
chip_gen: v7x
topology: tpu7x:2x2x1
jax: 0.10.0
libtpu: 0.0.40
codegen_flags: <defaults>
</compile_context>

<pallas_src>
import functools

import jax
import jax.numpy as jnp
from jax.experimental import pallas as pl
from jax.experimental.pallas import tpu as pltpu

LN_EPS = 1e-5
_BLOCK_N = 512   # class-dim tile (multiple of 256 -> full MXU columns on v6e/v7x)
_LANE = 128
_SUBLANE = 8


def _round_up(x: int, m: int) -> int:
    return ((x + m - 1) // m) * m


def prepare_classification_head_params(gamma, beta, weight, bias):
    """One-time parameter prep (do NOT call per forward pass).

    Folds the LayerNorm affine into the linear layer and pads/transposes the
    weight to a lane-dense (E, C_pad) layout:
        (xn * gamma + beta) @ W.T + b == xn @ (gamma[:,None] * W.T) + (beta @ W.T + b)
    """
    E = gamma.shape[0]
    C = weight.shape[0]
    C_pad = _round_up(max(C, 1), _LANE)
    if C_pad > _BLOCK_N:
        C_pad = _round_up(C_pad, _BLOCK_N)   # keep C_pad a multiple of the N tile

    dtype = jnp.promote_types(weight.dtype, gamma.dtype)
    w_t = weight.T.astype(dtype)                                   # (E, C)
    w_fused = gamma[:, None].astype(dtype) * w_t                   # fold LN scale
    b_fused = (bias + jnp.dot(beta, w_t,                           # fold LN shift
                              precision=jax.lax.Precision.HIGHEST)).astype(dtype)

    w_pad = jnp.zeros((E, C_pad), dtype=dtype).at[:, :C].set(w_fused)
    b_pad = jnp.zeros((1, C_pad), dtype=dtype).at[:, :C].set(b_fused)
    return w_pad, b_pad, C


def _head_kernel(x_ref, w_ref, b_ref, o_ref):
    # x_ref: (TB, E) CLS tokens; w_ref: (E, TN) fused weight tile;
    # b_ref: (1, TN) fused bias tile; o_ref: (TB, TN) logits tile.
    x0 = x_ref[...].astype(jnp.float32)

    # LayerNorm statistics in one pass (biased variance, eps=1e-5).
    mean = jnp.mean(x0, axis=-1, keepdims=True)
    mean_sq = jnp.mean(x0 * x0, axis=-1, keepdims=True)
    var = jnp.maximum(mean_sq - mean * mean, 0.0)
    xn = (x0 - mean) * jax.lax.rsqrt(var + LN_EPS)        # rsqrt -> EUP slot

    # Fused linear: xn @ W' + b'  (gamma/beta already folded into W', b').
    out = jnp.dot(xn.astype(w_ref.dtype), w_ref[...],
                  preferred_element_type=jnp.float32)
    out = out + b_ref[...].astype(jnp.float32)
    o_ref[...] = out.astype(o_ref.dtype)


def _choose_batch_tile(B: int, E: int) -> int:
    # Keep f32 LN temporaries + double-buffered x blocks VMEM-friendly for
    # large E (v7x has only 32 MiB scoped / 64 MiB physical VMEM).
    if E >= 8192:
        max_tb = 64
    elif E >= 4096:
        max_tb = 128
    else:
        max_tb = 256

    if B <= max_tb:
        # A full-dim batch block is always layout-legal (no padding needed).
        # Split in two for megacore / v7x dual-TC when B is large enough to
        # amortize the ~0.35 us/step overhead and splits cleanly.
        if B >= 128 and B % 16 == 0:
            return B // 2
        return B
    # B > max_tb: multiple-of-8 tile; the cdiv grid masks the partial last
    # block (no HBM padding copy, at most TB-1 wasted compute rows).
    steps = pl.cdiv(B, max_tb)
    tb = _round_up(pl.cdiv(B, steps), _SUBLANE)
    return min(tb, max_tb)


def classification_head(x, params, *, out_dtype=None):
    """x: (B, S, E). params: output of prepare_classification_head_params."""
    w_pad, b_pad, n_classes = params
    B, S, E = x.shape
    C_pad = w_pad.shape[1]
    assert w_pad.shape[0] == E, (w_pad.shape, E)

    if out_dtype is None:
        out_dtype = jnp.promote_types(x.dtype, w_pad.dtype)

    # CLS selection without an extra HBM pass: for lane-aligned E the contiguous
    # reshape (B, S, E) -> (B, S*E) is free, and the (TB, E) block at column
    # block 0 DMAs exactly the CLS token of every row. For small/unaligned E
    # fall back to an explicit slice (only B*E elements).
    if E % _LANE == 0:
        x2 = x.reshape(B, S * E)
    else:
        x2 = x[:, 0, :]

    TB = _choose_batch_tile(B, E)
    TN = min(C_pad, _BLOCK_N)
    num_b = pl.cdiv(B, TB)
    num_n = C_pad // TN
    grid = (num_n, num_b)   # weight tile resident across the inner batch axis

    x_bytes = jnp.dtype(x.dtype).itemsize
    w_bytes = jnp.dtype(w_pad.dtype).itemsize
    o_bytes = jnp.dtype(out_dtype).itemsize
    block_footprint = (2 * TB * E * x_bytes        # double-buffered x blocks
                       + 2 * E * TN * w_bytes      # double-buffered weight blocks
                       + 2 * TN * w_bytes          # bias
                       + 2 * TB * TN * o_bytes     # output blocks
                       + 6 * TB * E * 4)           # f32 LN temporaries headroom
    vmem_limit = int(min(64 << 20, max(32 << 20, 2 * block_footprint)))

    out = pl.pallas_call(
        _head_kernel,
        out_shape=jax.ShapeDtypeStruct((B, C_pad), out_dtype),
        grid_spec=pltpu.PrefetchScalarGridSpec(
            num_scalar_prefetch=0,
            grid=grid,
            in_specs=[
                pl.BlockSpec((TB, E), lambda j, i: (i, 0)),   # CLS rows, streamed over batch
                pl.BlockSpec((E, TN), lambda j, i: (0, j)),   # fused weight tile (resident per j)
                pl.BlockSpec((1, TN), lambda j, i: (0, j)),   # fused bias tile
            ],
            out_specs=pl.BlockSpec((TB, TN), lambda j, i: (i, j)),
        ),
        compiler_params=pltpu.CompilerParams(
            dimension_semantics=("parallel", "parallel"),     # megacore / 2-TC sharding
            vmem_limit_bytes=vmem_limit,
        ),
        cost_estimate=pl.CostEstimate(
            flops=2 * B * E * C_pad + 8 * B * E,
            transcendentals=B,
            bytes_accessed=(B * E * x_bytes + E * C_pad * w_bytes
                            + C_pad * w_bytes + B * C_pad * o_bytes),
        ),
    )(x2, w_pad, b_pad)

    return out[:, :n_classes]


def _reference(x, gamma, beta, weight, bias):
    # Pure-JAX reference reproducing the PyTorch forward exactly.
    mean = jnp.mean(x, axis=-1, keepdims=True)
    var = jnp.mean((x - mean) ** 2, axis=-1, keepdims=True)
    xn = (x - mean) / jnp.sqrt(var + LN_EPS)
    xn = xn * gamma + beta
    cls = xn[:, 0]
    return jnp.dot(cls, weight.T, precision=jax.lax.Precision.HIGHEST) + bias


if __name__ == "__main__":
    def _run_case(B, S, E, C, key):
        kx, kg, kb, kw, kbi = jax.random.split(key, 5)
        x = jax.random.normal(kx, (B, S, E), dtype=jnp.float32)
        gamma = 1.0 + 0.1 * jax.random.normal(kg, (E,), dtype=jnp.float32)
        beta = 0.1 * jax.random.normal(kb, (E,), dtype=jnp.float32)
        weight = jax.random.normal(kw, (C, E), dtype=jnp.float32) / jnp.sqrt(E)
        bias = 0.01 * jax.random.normal(kbi, (C,), dtype=jnp.float32)

        params = prepare_classification_head_params(gamma, beta, weight, bias)
        fwd = jax.jit(functools.partial(classification_head, params=params))
        out = jax.block_until_ready(fwd(x))

        ref = _reference(x, gamma, beta, weight, bias)
        assert out.shape == (B, C), out.shape
        assert jnp.allclose(out, ref, atol=1e-4, rtol=1e-4), (out, ref)

    key = jax.random.PRNGKey(0)
    k0, k1 = jax.random.split(key)
    # Small shapes consistent with the module: batch=2, seq=8, emb_size=32, n_classes=2
    _run_case(2, 8, 32, 2, k0)    # unaligned E -> wrapper CLS slice path
    _run_case(2, 8, 128, 2, k1)   # lane-aligned E -> CLS selected via BlockSpec on free reshape

    print("KERNEL_OK")
</pallas_src>

<mosaic_0001>
module attributes {stable_mosaic.version = 11 : i64} {
  func.func @_head_kernel(%arg0: i32, %arg1: i32, %arg2: memref<2x32xf32, #tpu.memory_space<vmem>>, %arg3: memref<32x128xf32, #tpu.memory_space<vmem>>, %arg4: memref<1x128xf32, #tpu.memory_space<vmem>>, %arg5: memref<2x128xf32, #tpu.memory_space<vmem>>) attributes {dimension_semantics = [#tpu.dimension_semantics<parallel>, #tpu.dimension_semantics<parallel>], iteration_bounds = array<i64: 1, 1>, scalar_prefetch = 0 : i64, scratch_operands = 0 : i64, tpu.core_type = #tpu.core_type<tc>, window_params = [{transform_indices = @transform_0, window_bounds = array<i64: 2, 32>}, {transform_indices = @transform_1, window_bounds = array<i64: 32, 128>}, {transform_indices = @transform_2, window_bounds = array<i64: 1, 128>}, {transform_indices = @transform_3, window_bounds = array<i64: 2, 128>}]} {
    %c0 = arith.constant 0 : index
    %c0_0 = arith.constant 0 : index
    %0 = vector.load %arg2[%c0, %c0_0] : memref<2x32xf32, #tpu.memory_space<vmem>>, vector<2x32xf32>
    %cst = arith.constant dense<0.000000e+00> : vector<2xf32>
    %1 = vector.multi_reduction <add>, %0, %cst [1] : vector<2x32xf32> to vector<2xf32>
    %2 = vector.shape_cast %1 : vector<2xf32> to vector<2x1xf32>
    %cst_1 = arith.constant 3.200000e+01 : f32
    %3 = vector.broadcast %cst_1 : f32 to vector<2x1xf32>
    %4 = arith.divf %2, %3 : vector<2x1xf32>
    %5 = arith.mulf %0, %0 : vector<2x32xf32>
    %cst_2 = arith.constant dense<0.000000e+00> : vector<2xf32>
    %6 = vector.multi_reduction <add>, %5, %cst_2 [1] : vector<2x32xf32> to vector<2xf32>
    %7 = vector.shape_cast %6 : vector<2xf32> to vector<2x1xf32>
    %cst_3 = arith.constant 3.200000e+01 : f32
    %8 = vector.broadcast %cst_3 : f32 to vector<2x1xf32>
    %9 = arith.divf %7, %8 : vector<2x1xf32>
    %10 = arith.mulf %4, %4 : vector<2x1xf32>
    %11 = arith.subf %9, %10 : vector<2x1xf32>
    %cst_4 = arith.constant 0.000000e+00 : f32
    %12 = vector.broadcast %cst_4 : f32 to vector<2x1xf32>
    %13 = arith.maximumf %11, %12 : vector<2x1xf32>
    %14 = vector.broadcast %4 : vector<2x1xf32> to vector<2x32xf32>
    %15 = arith.subf %0, %14 : vector<2x32xf32>
    %cst_5 = arith.constant 9.99999974E-6 : f32
    %16 = vector.broadcast %cst_5 : f32 to vector<2x1xf32>
    %17 = arith.addf %13, %16 : vector<2x1xf32>
    %18 = math.rsqrt %17 : vector<2x1xf32>
    %19 = vector.broadcast %18 : vector<2x1xf32> to vector<2x32xf32>
    %20 = arith.mulf %15, %19 : vector<2x32xf32>
    %c0_6 = arith.constant 0 : index
    %c0_7 = arith.constant 0 : index
    %21 = vector.load %arg3[%c0_6, %c0_7] : memref<32x128xf32, #tpu.memory_space<vmem>>, vector<32x128xf32>
    %cst_8 = arith.constant dense<0.000000e+00> : vector<2x128xf32>
    %22 = tpu.matmul %20, %21, %cst_8 {dimension_numbers = #tpu.dot_dimension_numbers<[1], [0], [0], [1], [0, 0, 1, 1], [], []>} : vector<2x32xf32>, vector<32x128xf32>, vector<2x128xf32> -> vector<2x128xf32>
    %c0_9 = arith.constant 0 : index
    %c0_10 = arith.constant 0 : index
    %23 = vector.load %arg4[%c0_9, %c0_10] : memref<1x128xf32, #tpu.memory_space<vmem>>, vector<1x128xf32>
    %24 = vector.broadcast %23 : vector<1x128xf32> to vector<2x128xf32>
    %25 = arith.addf %22, %24 : vector<2x128xf32>
    %c0_11 = arith.constant 0 : index
    %c0_12 = arith.constant 0 : index
    %26 = vector.load %arg5[%c0_11, %c0_12] : memref<2x128xf32, #tpu.memory_space<vmem>>, vector<2x128xf32>
    tpu.vector_store %arg5[%c0_11, %c0_12], %25 {strides = array<i32>} : memref<2x128xf32, #tpu.memory_space<vmem>>, vector<2x128xf32>,
    return
  }
  func.func @transform_0(%arg0: i32, %arg1: i32) -> (i32, i32) {
    %c0_i32 = arith.constant 0 : i32
    %c0_i32_0 = arith.constant 0 : i32
    return %arg1, %c0_i32 : i32, i32
  }
  func.func @transform_1(%arg0: i32, %arg1: i32) -> (i32, i32) {
    %c0_i32 = arith.constant 0 : i32
    %c0_i32_0 = arith.constant 0 : i32
    return %c0_i32, %arg0 : i32, i32
  }
  func.func @transform_2(%arg0: i32, %arg1: i32) -> (i32, i32) {
    %c0_i32 = arith.constant 0 : i32
    %c0_i32_0 = arith.constant 0 : i32
    return %c0_i32, %arg0 : i32, i32
  }
  func.func @transform_3(%arg0: i32, %arg1: i32) -> (i32, i32) {
    %c0_i32 = arith.constant 0 : i32
    return %arg1, %arg0 : i32, i32
  }
}

</mosaic_0001>

<bundles_post_ra>
// kernel: classification_head.1
= control target key start
LH: loop header
LB: loop body
LE: loop exit
PB: predicated region body
PF: predicated region fallthrough
CT: control target
= control target key end

     0   :  { %8 = vsyncpa [#allocation3], 0  ;;  %s287_s0 = inlined_call_operand.vmem [shape: f32[2,32], index: 0, kind: input, shape index: {}]   ;;  %s288_s1 = inlined_call_operand.hbm [shape: f32[32,128], index: 1, kind: input, shape index: {}]   ;;  %s289_s2 = inlined_call_operand.vmem [shape: f32[1,128], index: 2, kind: input, shape index: {}]   ;;  %s290_s3 = inlined_call_operand.hbm [shape: f32[2,128], index: 3, kind: output, shape index: {}]  }
   0x1   :  { %9 = vsyncpa [#allocation4], 0  ;;  %s230_s12 = smov [#allocation2]   ;;  %s182_s16 = scalar_lea.hbm %s288_s1, 512 }
   0x2   :  { %s17_s13 = sshll.u32 %s230_s12, 4  ;;  %p183_p0 = scmp.ne.s32.totalorder %s288_s1, %s182_s16  ;;  %s18_s13 = int_to_ptr.vmem [resolvable:$true] %s17_s13 }
   0x3   :  { %p186_p1 = scmp.lt.u32.totalorder %s182_s16, %s288_s1 }
   0x5   :  { %p188_p2 = pnand %p186_p1, %p183_p0 }
   0x7   :  { %191 = shalt.err (!%p188_p2)
}
   0x8   :  { %s192_s21 = scalar_lea.vmem %s18_s13, 512  ;;  %p197_p4 = scmp.lt.s32.totalorder %s18_s13, %s18_s13 }
   0x9   :  { %p193_p3 = scmp.ne.s32.totalorder %s18_s13, %s192_s21  ;;  %p198_p5 = scmp.lt.s32.totalorder %s192_s21, %s192_s21 }
   0xb   :  { %p199_p6 = por %p198_p5, %p197_p4 }
   0xd   :  { %p200_p7 = pnand %p199_p6, %p193_p3 }
   0xf   :  { %203 = shalt.err (!%p200_p7)
}
  0x10   :  { %s231_s22 = smov 128   ;;  %s232_s23 = smov 8  }
  0x11   :  { %23 = dma.hbm_to_vmem [thread:$0]  %s288_s1, 512, %s18_s13, [#allocation3], %s231_s22, %s231_s22, %s232_s23  }
  0x12   :  { %226 = dma.done.wait [#allocation3], 512  }
  0x13   :  { %227 = vsyncadd [#allocation3], 4294966784  ;;  %vm30_vm0 = vcmask 254976   ;;  %v29_v0 = vld [vmem:[%s287_s0] sm:$0x3]  ;;  %v49_v5 = vld [vmem:[#allocation2 + $0x8] sm:$0xff] }
  0x14   :  { %v31_v1 = vsel %vm30_vm0, %v29_v0, 0.0  ;;  %v36_v2 = vmul.f32 %v29_v0, %v29_v0  ;;  %v48_v4 = vld [vmem:[#allocation2] sm:$0xff]  ;;  %v50_v6 = vld [vmem:[#allocation2 + $0x10] sm:$0xff]  ;;  %v233_v7 = vmov 0.0|0.0   ;;  %v51_v9 = vld [vmem:[#allocation2 + $0x18] sm:$0xff]  ;;  %vm234_vm1 = vmmov 0  }
  0x15   :  { %32 = vadd.xlane.f32.xlu0 %v31_v1  ;;  %167 = vmatprep.subr.bf16.mxu0 %v233_v7  ;;  %v168_v8 = vpack.c.bf16 %v49_v5, %v48_v4  ;;  %v235_v10 = vmov 0.0   ;;  %v171_v11 = vpack.c.bf16 %v51_v9, %v50_v6  ;;  %vm59_vm2 = vcmask 261120   ;;  %v149_v23 = vld [vmem:[%s289_s2] ss:$0 sm:$0xff]  ;;  %s236_s28 = smov [#allocation5]  }
  0x16   :  { %v37_v3 = vsel %vm30_vm0, %v36_v2, 0.0  ;;  %164 = vmatprep.mubr.msk.f32.mxu0 %vm234_vm1, %v235_v10  ;;  %s140_s29 = sshll.u32 %s236_s28, 4  ;;  %s141_s29 = int_to_ptr.vmem [resolvable:$true] %s140_s29 }
  0x17   :  { %169 = vmatpush3.bf16.msra.mxu0 %v168_v8  ;;  %s204_s30 = scalar_lea.vmem %s141_s29, 32  ;;  %p209_p9 = scmp.lt.s32.totalorder %s141_s29, %s141_s29 }
  0x18   :  { %170 = vmatprep.subr.bf16.mxu0 %v233_v7  ;;  %p205_p8 = scmp.ne.s32.totalorder %s141_s29, %s204_s30  ;;  %p210_p10 = scmp.lt.s32.totalorder %s204_s30, %s204_s30 }
  0x19   :  { %38 = vadd.xlane.f32.xlu0 %v37_v3 }
  0x1a   :  { %p211_p11 = por %p210_p10, %p209_p9 }
  0x1b   :  { %172 = vmatpush3.bf16.msra.mxu0 %v171_v11 }
  0x1c   :  { %p212_p12 = pnand %p211_p11, %p205_p8 }
  0xa2   :  { %v33_v12 = vpop.xlane.xlu0 %32 }
  0xa3   :  { %v35_v13 = vmul.f32 0.03125, %v33_v12 }
  0xa5   :  { %v41_v15 = vmul.f32 %v35_v13, %v35_v13  ;;  %v44_v20 = vsub.f32 %v29_v0, %v35_v13 }
  0xa6   :  { %v39_v14 = vpop.xlane.xlu0 %38 }
  0xa7   :  { %v40_v16 = vmul.f32 0.03125, %v39_v14 }
  0xa9   :  { %v42_v17 = vsub.f32 %v40_v16, %v41_v15 }
  0xab   :  { %v43_v18 = vmax.f32 %v42_v17, 0.0 }
  0xad   :  { %v45_v19 = vadd.f32 1e-05, %v43_v18 }
  0xaf   :  { %180 = vrsqrt.f32 %v45_v19 }
  0xb9   :  { %v181_v21 = vpop.eup %180 }
  0xba   :  { %v47_v22 = vmul.f32 %v181_v21, %v44_v20 }
  0xbc   :  { %165 = vmatmul.mubr.msk.f32.vlgmr.msra.gmra.mrb[0].mxu0 %vm59_vm2, %v47_v22 }
 0x18f   :  { %v129_v24 = vpop.f32.mrb[0].mxu0 }
 0x190   :  { %v130_v25 = vadd.f32 %v149_v23, %v129_v24  ;;  %v166_v26 = vpop.f32.mrb[1].mxu0 }
 0x192   :  { %133 = vst [vmem:[#allocation5] sm:$0x3] %v130_v25 }
 0x193   :  { %215 = shalt.err (!%p212_p12)
}
 0x194   :  { %s216_s6 = scalar_lea.hbm %s290_s3, 32 }
 0x195   :  { %p217_p13 = scmp.ne.s32.totalorder %s290_s3, %s216_s6  ;;  %p220_p0 = scmp.lt.u32.totalorder %s216_s6, %s290_s3 }
 0x197   :  { %p222_p1 = pnand %p220_p0, %p217_p13 }
 0x199   :  { %225 = shalt.err (!%p222_p1)
}
 0x19a   :  { %143 = dma.vmem_to_hbm [thread:$0]  %s141_s29, 32, %s290_s3, [#allocation4]  }
 0x19b   :  { %228 = dma.done.wait [#allocation4], 32  }
 0x19c   :  { %229 = vsyncadd [#allocation4], 4294967264 }
 0x19d   :  { %147 = vsyncpa [#allocation3], 1 }
 0x19e   :  { %148 = vsyncpa [#allocation4], 1 }

</bundles_post_ra>
